<compile_context>
chip_gen: v6e
topology: v6e:2x2x1
jax: 0.10.0
libtpu: 0.0.40
codegen_flags: <defaults>
</compile_context>

<pallas_src>
import functools

import jax
import jax.numpy as jnp
from jax.experimental import pallas as pl
from jax.experimental.pallas import tpu as pltpu

_BN_EPS = 1e-5
_LANE = 128


def _round_up(n, m=_LANE):
    return ((n + m - 1) // m) * m


def _pick_tile_n(n_padded, max_tile=256):
    """Largest multiple of 128 that divides n_padded and is <= max_tile."""
    t = min(max_tile, n_padded)
    while n_padded % t:
        t -= _LANE
    return t


def _layer_kernel(x_ref, w_ref, gb_ref, o_ref, *, relu):
    """One projection-MLP layer on an output-feature tile.

    x_ref : [B, K]   bf16, fully resident (BN needs the whole batch)
    w_ref : [K, tn]  bf16 weight N-tile
    gb_ref: [2, tn]  f32, row 0 = gamma, row 1 = beta
    o_ref : [B, tn]  lane-dense output tile

    BN statistics are per-feature over the batch axis, so independent N tiles
    are exact (no cross-tile reduction).  The Linear bias is omitted on purpose:
    BN's batch-mean subtraction cancels it exactly.
    """
    # MXU matmul: bf16 operands, f32 accumulation.
    h = jnp.dot(x_ref[...], w_ref[...], preferred_element_type=jnp.float32)

    # Training-mode BatchNorm1d: batch mean / biased batch variance (f32).
    mean = jnp.mean(h, axis=0, keepdims=True)
    centered = h - mean
    var = jnp.mean(centered * centered, axis=0, keepdims=True)
    h = centered * jax.lax.rsqrt(var + _BN_EPS)
    h = h * gb_ref[0:1, :] + gb_ref[1:2, :]

    if relu:
        h = jnp.maximum(h, 0.0)

    o_ref[...] = h.astype(o_ref.dtype)


def _layer(x, w, gb, *, relu, out_dtype, max_tile_n=256):
    """Linear (no bias) -> BN(train) -> optional ReLU, N-tiled pallas_call."""
    B, K = x.shape
    Kw, N = w.shape
    assert K == Kw, (K, Kw)
    tn = _pick_tile_n(N, max_tile_n)
    grid = (N // tn,)

    return pl.pallas_call(
        functools.partial(_layer_kernel, relu=relu),
        out_shape=jax.ShapeDtypeStruct((B, N), out_dtype),
        grid=grid,
        in_specs=[
            pl.BlockSpec((B, K), lambda j: (0, 0)),    # x fully resident across N tiles
            pl.BlockSpec((K, tn), lambda j: (0, j)),   # weight N-tile (pipelined)
            pl.BlockSpec((2, tn), lambda j: (0, j)),   # fused [gamma; beta] N-tile
        ],
        out_specs=pl.BlockSpec((B, tn), lambda j: (0, j)),  # lane-dense (tn % 128 == 0)
        compiler_params=pltpu.CompilerParams(
            dimension_semantics=("parallel",)),        # v7x: N tiles split across both TCs
    )(x, w, gb)


@functools.partial(jax.jit, static_argnames=("out_dim", "out_dtype"))
def projection_mlp_forward(x, params, out_dim, out_dtype=jnp.float32):
    """Full 3-layer projection MLP (training-mode BN), padded/tiled internally."""
    in_pad = params["w1"].shape[0]
    x = x.astype(jnp.bfloat16)
    if x.shape[1] != in_pad:
        x = jnp.pad(x, ((0, 0), (0, in_pad - x.shape[1])))

    # Intermediates stored bf16 (halves HBM round-trip); final layer in out_dtype.
    h = _layer(x, params["w1"], params["gb1"], relu=True, out_dtype=jnp.bfloat16)
    h = _layer(h, params["w2"], params["gb2"], relu=True, out_dtype=jnp.bfloat16)
    h = _layer(h, params["w3"], params["gb3"], relu=False, out_dtype=out_dtype)
    return h[:, :out_dim]   # strip feature padding


def init_params(key, in_dim, hidden_dim, out_dim):
    """PyTorch-style Linear init (U(-1/sqrt(fan_in), 1/sqrt(fan_in))) with:
       - feature dims zero-padded to multiples of 128 (lane-dense),
       - weights stored pre-transposed [in, out] in bf16,
       - no Linear bias (cancelled by training-mode BN),
       - gamma/beta stacked as one [2, N] f32 array per layer.
    """
    in_p, hid_p, out_p = _round_up(in_dim), _round_up(hidden_dim), _round_up(out_dim)
    k1, k2, k3 = jax.random.split(key, 3)

    def linear_w(k, fan_in, fan_out, fan_in_p, fan_out_p):
        bound = 1.0 / float(fan_in) ** 0.5
        w = jax.random.uniform(k, (fan_in, fan_out), jnp.float32, -bound, bound)
        w = jnp.pad(w, ((0, fan_in_p - fan_in), (0, fan_out_p - fan_out)))
        return w.astype(jnp.bfloat16)

    def gamma_beta(feat, feat_p):
        gamma = jnp.pad(jnp.ones((1, feat), jnp.float32),
                        ((0, 0), (0, feat_p - feat)), constant_values=1.0)
        beta = jnp.zeros((1, feat_p), jnp.float32)
        return jnp.concatenate([gamma, beta], axis=0)

    return {
        "w1": linear_w(k1, in_dim, hidden_dim, in_p, hid_p),
        "gb1": gamma_beta(hidden_dim, hid_p),
        "w2": linear_w(k2, hidden_dim, hidden_dim, hid_p, hid_p),
        "gb2": gamma_beta(hidden_dim, hid_p),
        "w3": linear_w(k3, hidden_dim, out_dim, hid_p, out_p),
        "gb3": gamma_beta(out_dim, out_p),
    }


def _reference_matched(x, params, out_dim):
    """Pure-JAX mirror of the kernel path (same padding / bf16 casts) — tight check."""
    def layer(h, w, gb, relu, dtype):
        y = jnp.dot(h.astype(jnp.bfloat16), w, preferred_element_type=jnp.float32)
        m = jnp.mean(y, axis=0, keepdims=True)
        c = y - m
        v = jnp.mean(c * c, axis=0, keepdims=True)
        y = c * jax.lax.rsqrt(v + _BN_EPS) * gb[0:1] + gb[1:2]
        if relu:
            y = jnp.maximum(y, 0.0)
        return y.astype(dtype)

    in_p = params["w1"].shape[0]
    h = jnp.pad(x.astype(jnp.bfloat16), ((0, 0), (0, in_p - x.shape[1])))
    h = layer(h, params["w1"], params["gb1"], True, jnp.bfloat16)
    h = layer(h, params["w2"], params["gb2"], True, jnp.bfloat16)
    h = layer(h, params["w3"], params["gb3"], False, jnp.float32)
    return h[:, :out_dim]


def _reference_f32(x, params, in_dim, hidden_dim, out_dim):
    """Unpadded f32 reference of the PyTorch semantics (loose check of padding/layout)."""
    def bn(h, g, b):
        m = jnp.mean(h, axis=0, keepdims=True)
        v = jnp.mean((h - m) ** 2, axis=0, keepdims=True)
        return (h - m) / jnp.sqrt(v + _BN_EPS) * g + b

    w1 = params["w1"][:in_dim, :hidden_dim].astype(jnp.float32)
    w2 = params["w2"][:hidden_dim, :hidden_dim].astype(jnp.float32)
    w3 = params["w3"][:hidden_dim, :out_dim].astype(jnp.float32)
    g1, b1 = params["gb1"][0, :hidden_dim], params["gb1"][1, :hidden_dim]
    g2, b2 = params["gb2"][0, :hidden_dim], params["gb2"][1, :hidden_dim]
    g3, b3 = params["gb3"][0, :out_dim], params["gb3"][1, :out_dim]

    h = jnp.maximum(bn(x @ w1, g1, b1), 0.0)
    h = jnp.maximum(bn(h @ w2, g2, b2), 0.0)
    h = bn(h @ w3, g3, b3)
    return h


if __name__ == "__main__":
    # Small shapes consistent with projection_MLP defaults (hidden=512, out=128).
    B, in_dim, hidden_dim, out_dim = 8, 64, 512, 128

    root = jax.random.PRNGKey(0)
    kx, kp = jax.random.split(root)
    x = jax.random.normal(kx, (B, in_dim), jnp.float32)
    params = init_params(kp, in_dim, hidden_dim, out_dim)

    out = projection_mlp_forward(x, params, out_dim)
    out = jax.block_until_ready(out)
    assert out.shape == (B, out_dim)

    # Tight check against a precision-matched pure-JAX mirror of the kernel math.
    ref_m = _reference_matched(x, params, out_dim)
    assert jnp.allclose(out, ref_m, atol=1e-2, rtol=1e-2), \
        "Pallas output mismatch vs precision-matched reference"

    # Loose check against full-f32 PyTorch-semantics reference (guards padding/layout).
    ref_f = _reference_f32(x, params, in_dim, hidden_dim, out_dim)
    assert jnp.allclose(out, ref_f, atol=1e-1, rtol=1e-1), \
        "Pallas output mismatch vs f32 reference"

    # TODO(synk): BatchNorm running_mean/running_var updates (training-mode side
    # effect) are not materialized; they do not affect the forward output.
    print("KERNEL_OK")
</pallas_src>

<mosaic_0001>
module attributes {stable_mosaic.version = 11 : i64} {
  func.func @_layer_kernel(%arg0: i32, %arg1: memref<8x512xbf16, #tpu.memory_space<vmem>>, %arg2: memref<512x256xbf16, #tpu.memory_space<vmem>>, %arg3: memref<2x256xf32, #tpu.memory_space<vmem>>, %arg4: memref<8x256xbf16, #tpu.memory_space<vmem>>) attributes {dimension_semantics = [#tpu.dimension_semantics<parallel>], iteration_bounds = array<i64: 2>, scalar_prefetch = 0 : i64, scratch_operands = 0 : i64, tpu.core_type = #tpu.core_type<tc>, window_params = [{pipeline_mode = #tpu.pipeline_mode<synchronous>, transform_indices = @transform_0, window_bounds = array<i64: 8, 512>}, {transform_indices = @transform_1, window_bounds = array<i64: 512, 256>}, {transform_indices = @transform_2, window_bounds = array<i64: 2, 256>}, {transform_indices = @transform_3, window_bounds = array<i64: 8, 256>}]} {
    %c0 = arith.constant 0 : index
    %c0_0 = arith.constant 0 : index
    %0 = vector.load %arg1[%c0, %c0_0] : memref<8x512xbf16, #tpu.memory_space<vmem>>, vector<8x512xbf16>
    %c0_1 = arith.constant 0 : index
    %c0_2 = arith.constant 0 : index
    %1 = vector.load %arg2[%c0_1, %c0_2] : memref<512x256xbf16, #tpu.memory_space<vmem>>, vector<512x256xbf16>
    %cst = arith.constant dense<0.000000e+00> : vector<8x256xf32>
    %2 = tpu.matmul %0, %1, %cst {dimension_numbers = #tpu.dot_dimension_numbers<[1], [0], [0], [1], [0, 0, 1, 1], [], []>} : vector<8x512xbf16>, vector<512x256xbf16>, vector<8x256xf32> -> vector<8x256xf32>
    %cst_3 = arith.constant dense<0.000000e+00> : vector<256xf32>
    %3 = vector.multi_reduction <add>, %2, %cst_3 [0] : vector<8x256xf32> to vector<256xf32>
    %4 = vector.shape_cast %3 : vector<256xf32> to vector<1x256xf32>
    %cst_4 = arith.constant 8.000000e+00 : f32
    %5 = vector.broadcast %cst_4 : f32 to vector<1x256xf32>
    %6 = arith.divf %4, %5 : vector<1x256xf32>
    %7 = vector.broadcast %6 : vector<1x256xf32> to vector<8x256xf32>
    %8 = arith.subf %2, %7 : vector<8x256xf32>
    %9 = arith.mulf %8, %8 : vector<8x256xf32>
    %cst_5 = arith.constant dense<0.000000e+00> : vector<256xf32>
    %10 = vector.multi_reduction <add>, %9, %cst_5 [0] : vector<8x256xf32> to vector<256xf32>
    %11 = vector.shape_cast %10 : vector<256xf32> to vector<1x256xf32>
    %cst_6 = arith.constant 8.000000e+00 : f32
    %12 = vector.broadcast %cst_6 : f32 to vector<1x256xf32>
    %13 = arith.divf %11, %12 : vector<1x256xf32>
    %cst_7 = arith.constant 9.99999974E-6 : f32
    %14 = vector.broadcast %cst_7 : f32 to vector<1x256xf32>
    %15 = arith.addf %13, %14 : vector<1x256xf32>
    %16 = math.rsqrt %15 : vector<1x256xf32>
    %17 = vector.broadcast %16 : vector<1x256xf32> to vector<8x256xf32>
    %18 = arith.mulf %8, %17 : vector<8x256xf32>
    %c0_8 = arith.constant 0 : index
    %c0_9 = arith.constant 0 : index
    %19 = vector.load %arg3[%c0_8, %c0_9] : memref<2x256xf32, #tpu.memory_space<vmem>>, vector<1x256xf32>
    %20 = vector.broadcast %19 : vector<1x256xf32> to vector<8x256xf32>
    %21 = arith.mulf %18, %20 : vector<8x256xf32>
    %c1 = arith.constant 1 : index
    %c0_10 = arith.constant 0 : index
    %22 = vector.load %arg3[%c1, %c0_10] : memref<2x256xf32, #tpu.memory_space<vmem>>, vector<1x256xf32>
    %23 = vector.broadcast %22 : vector<1x256xf32> to vector<8x256xf32>
    %24 = arith.addf %21, %23 : vector<8x256xf32>
    %cst_11 = arith.constant 0.000000e+00 : f32
    %25 = vector.broadcast %cst_11 : f32 to vector<8x256xf32>
    %26 = arith.maximumf %24, %25 : vector<8x256xf32>
    %27 = arith.truncf %26 : vector<8x256xf32> to vector<8x256xbf16>
    %c0_12 = arith.constant 0 : index
    %c0_13 = arith.constant 0 : index
    %28 = vector.load %arg4[%c0_12, %c0_13] : memref<8x256xbf16, #tpu.memory_space<vmem>>, vector<8x256xbf16>
    tpu.vector_store %arg4[%c0_12, %c0_13], %27 {strides = array<i32>} : memref<8x256xbf16, #tpu.memory_space<vmem>>, vector<8x256xbf16>,
    return
  }
  func.func @transform_0(%arg0: i32) -> (i32, i32) {
    %c0_i32 = arith.constant 0 : i32
    %c0_i32_0 = arith.constant 0 : i32
    %c0_i32_1 = arith.constant 0 : i32
    return %c0_i32, %c0_i32_0 : i32, i32
  }
  func.func @transform_1(%arg0: i32) -> (i32, i32) {
    %c0_i32 = arith.constant 0 : i32
    %c0_i32_0 = arith.constant 0 : i32
    return %c0_i32, %arg0 : i32, i32
  }
  func.func @transform_2(%arg0: i32) -> (i32, i32) {
    %c0_i32 = arith.constant 0 : i32
    %c0_i32_0 = arith.constant 0 : i32
    return %c0_i32, %arg0 : i32, i32
  }
  func.func @transform_3(%arg0: i32) -> (i32, i32) {
    %c0_i32 = arith.constant 0 : i32
    %c0_i32_0 = arith.constant 0 : i32
    return %c0_i32, %arg0 : i32, i32
  }
}

module attributes {stable_mosaic.version = 11 : i64} {
  func.func @_layer_kernel(%arg0: i32, %arg1: memref<8x128xbf16, #tpu.memory_space<vmem>>, %arg2: memref<128x256xbf16, #tpu.memory_space<vmem>>, %arg3: memref<2x256xf32, #tpu.memory_space<vmem>>, %arg4: memref<8x256xbf16, #tpu.memory_space<vmem>>) attributes {dimension_semantics = [#tpu.dimension_semantics<parallel>], iteration_bounds = array<i64: 2>, scalar_prefetch = 0 : i64, scratch_operands = 0 : i64, tpu.core_type = #tpu.core_type<tc>, window_params = [{pipeline_mode = #tpu.pipeline_mode<synchronous>, transform_indices = @transform_0, window_bounds = array<i64: 8, 128>}, {transform_indices = @transform_1, window_bounds = array<i64: 128, 256>}, {transform_indices = @transform_2, window_bounds = array<i64: 2, 256>}, {transform_indices = @transform_3, window_bounds = array<i64: 8, 256>}]} {
    %c0 = arith.constant 0 : index
    %c0_0 = arith.constant 0 : index
    %0 = vector.load %arg1[%c0, %c0_0] : memref<8x128xbf16, #tpu.memory_space<vmem>>, vector<8x128xbf16>
    %c0_1 = arith.constant 0 : index
    %c0_2 = arith.constant 0 : index
    %1 = vector.load %arg2[%c0_1, %c0_2] : memref<128x256xbf16, #tpu.memory_space<vmem>>, vector<128x256xbf16>
    %cst = arith.constant dense<0.000000e+00> : vector<8x256xf32>
    %2 = tpu.matmul %0, %1, %cst {dimension_numbers = #tpu.dot_dimension_numbers<[1], [0], [0], [1], [0, 0, 1, 1], [], []>} : vector<8x128xbf16>, vector<128x256xbf16>, vector<8x256xf32> -> vector<8x256xf32>
    %cst_3 = arith.constant dense<0.000000e+00> : vector<256xf32>
    %3 = vector.multi_reduction <add>, %2, %cst_3 [0] : vector<8x256xf32> to vector<256xf32>
    %4 = vector.shape_cast %3 : vector<256xf32> to vector<1x256xf32>
    %cst_4 = arith.constant 8.000000e+00 : f32
    %5 = vector.broadcast %cst_4 : f32 to vector<1x256xf32>
    %6 = arith.divf %4, %5 : vector<1x256xf32>
    %7 = vector.broadcast %6 : vector<1x256xf32> to vector<8x256xf32>
    %8 = arith.subf %2, %7 : vector<8x256xf32>
    %9 = arith.mulf %8, %8 : vector<8x256xf32>
    %cst_5 = arith.constant dense<0.000000e+00> : vector<256xf32>
    %10 = vector.multi_reduction <add>, %9, %cst_5 [0] : vector<8x256xf32> to vector<256xf32>
    %11 = vector.shape_cast %10 : vector<256xf32> to vector<1x256xf32>
    %cst_6 = arith.constant 8.000000e+00 : f32
    %12 = vector.broadcast %cst_6 : f32 to vector<1x256xf32>
    %13 = arith.divf %11, %12 : vector<1x256xf32>
    %cst_7 = arith.constant 9.99999974E-6 : f32
    %14 = vector.broadcast %cst_7 : f32 to vector<1x256xf32>
    %15 = arith.addf %13, %14 : vector<1x256xf32>
    %16 = math.rsqrt %15 : vector<1x256xf32>
    %17 = vector.broadcast %16 : vector<1x256xf32> to vector<8x256xf32>
    %18 = arith.mulf %8, %17 : vector<8x256xf32>
    %c0_8 = arith.constant 0 : index
    %c0_9 = arith.constant 0 : index
    %19 = vector.load %arg3[%c0_8, %c0_9] : memref<2x256xf32, #tpu.memory_space<vmem>>, vector<1x256xf32>
    %20 = vector.broadcast %19 : vector<1x256xf32> to vector<8x256xf32>
    %21 = arith.mulf %18, %20 : vector<8x256xf32>
    %c1 = arith.constant 1 : index
    %c0_10 = arith.constant 0 : index
    %22 = vector.load %arg3[%c1, %c0_10] : memref<2x256xf32, #tpu.memory_space<vmem>>, vector<1x256xf32>
    %23 = vector.broadcast %22 : vector<1x256xf32> to vector<8x256xf32>
    %24 = arith.addf %21, %23 : vector<8x256xf32>
    %cst_11 = arith.constant 0.000000e+00 : f32
    %25 = vector.broadcast %cst_11 : f32 to vector<8x256xf32>
    %26 = arith.maximumf %24, %25 : vector<8x256xf32>
    %27 = arith.truncf %26 : vector<8x256xf32> to vector<8x256xbf16>
    %c0_12 = arith.constant 0 : index
    %c0_13 = arith.constant 0 : index
    %28 = vector.load %arg4[%c0_12, %c0_13] : memref<8x256xbf16, #tpu.memory_space<vmem>>, vector<8x256xbf16>
    tpu.vector_store %arg4[%c0_12, %c0_13], %27 {strides = array<i32>} : memref<8x256xbf16, #tpu.memory_space<vmem>>, vector<8x256xbf16>,
    return
  }
  func.func @transform_0(%arg0: i32) -> (i32, i32) {
    %c0_i32 = arith.constant 0 : i32
    %c0_i32_0 = arith.constant 0 : i32
    %c0_i32_1 = arith.constant 0 : i32
    return %c0_i32, %c0_i32_0 : i32, i32
  }
  func.func @transform_1(%arg0: i32) -> (i32, i32) {
    %c0_i32 = arith.constant 0 : i32
    %c0_i32_0 = arith.constant 0 : i32
    return %c0_i32, %arg0 : i32, i32
  }
  func.func @transform_2(%arg0: i32) -> (i32, i32) {
    %c0_i32 = arith.constant 0 : i32
    %c0_i32_0 = arith.constant 0 : i32
    return %c0_i32, %arg0 : i32, i32
  }
  func.func @transform_3(%arg0: i32) -> (i32, i32) {
    %c0_i32 = arith.constant 0 : i32
    %c0_i32_0 = arith.constant 0 : i32
    return %c0_i32, %arg0 : i32, i32
  }
}

module attributes {stable_mosaic.version = 11 : i64} {
  func.func @_layer_kernel(%arg0: i32, %arg1: memref<8x512xbf16, #tpu.memory_space<vmem>>, %arg2: memref<512x128xbf16, #tpu.memory_space<vmem>>, %arg3: memref<2x128xf32, #tpu.memory_space<vmem>>, %arg4: memref<8x128xf32, #tpu.memory_space<vmem>>) attributes {dimension_semantics = [#tpu.dimension_semantics<parallel>], iteration_bounds = array<i64: 1>, scalar_prefetch = 0 : i64, scratch_operands = 0 : i64, tpu.core_type = #tpu.core_type<tc>, window_params = [{pipeline_mode = #tpu.pipeline_mode<synchronous>, transform_indices = @transform_0, window_bounds = array<i64: 8, 512>}, {transform_indices = @transform_1, window_bounds = array<i64: 512, 128>}, {transform_indices = @transform_2, window_bounds = array<i64: 2, 128>}, {transform_indices = @transform_3, window_bounds = array<i64: 8, 128>}]} {
    %c0 = arith.constant 0 : index
    %c0_0 = arith.constant 0 : index
    %0 = vector.load %arg1[%c0, %c0_0] : memref<8x512xbf16, #tpu.memory_space<vmem>>, vector<8x512xbf16>
    %c0_1 = arith.constant 0 : index
    %c0_2 = arith.constant 0 : index
    %1 = vector.load %arg2[%c0_1, %c0_2] : memref<512x128xbf16, #tpu.memory_space<vmem>>, vector<512x128xbf16>
    %cst = arith.constant dense<0.000000e+00> : vector<8x128xf32>
    %2 = tpu.matmul %0, %1, %cst {dimension_numbers = #tpu.dot_dimension_numbers<[1], [0], [0], [1], [0, 0, 1, 1], [], []>} : vector<8x512xbf16>, vector<512x128xbf16>, vector<8x128xf32> -> vector<8x128xf32>
    %cst_3 = arith.constant dense<0.000000e+00> : vector<128xf32>
    %3 = vector.multi_reduction <add>, %2, %cst_3 [0] : vector<8x128xf32> to vector<128xf32>
    %4 = vector.shape_cast %3 : vector<128xf32> to vector<1x128xf32>
    %cst_4 = arith.constant 8.000000e+00 : f32
    %5 = vector.broadcast %cst_4 : f32 to vector<1x128xf32>
    %6 = arith.divf %4, %5 : vector<1x128xf32>
    %7 = vector.broadcast %6 : vector<1x128xf32> to vector<8x128xf32>
    %8 = arith.subf %2, %7 : vector<8x128xf32>
    %9 = arith.mulf %8, %8 : vector<8x128xf32>
    %cst_5 = arith.constant dense<0.000000e+00> : vector<128xf32>
    %10 = vector.multi_reduction <add>, %9, %cst_5 [0] : vector<8x128xf32> to vector<128xf32>
    %11 = vector.shape_cast %10 : vector<128xf32> to vector<1x128xf32>
    %cst_6 = arith.constant 8.000000e+00 : f32
    %12 = vector.broadcast %cst_6 : f32 to vector<1x128xf32>
    %13 = arith.divf %11, %12 : vector<1x128xf32>
    %cst_7 = arith.constant 9.99999974E-6 : f32
    %14 = vector.broadcast %cst_7 : f32 to vector<1x128xf32>
    %15 = arith.addf %13, %14 : vector<1x128xf32>
    %16 = math.rsqrt %15 : vector<1x128xf32>
    %17 = vector.broadcast %16 : vector<1x128xf32> to vector<8x128xf32>
    %18 = arith.mulf %8, %17 : vector<8x128xf32>
    %c0_8 = arith.constant 0 : index
    %c0_9 = arith.constant 0 : index
    %19 = vector.load %arg3[%c0_8, %c0_9] : memref<2x128xf32, #tpu.memory_space<vmem>>, vector<1x128xf32>
    %20 = vector.broadcast %19 : vector<1x128xf32> to vector<8x128xf32>
    %21 = arith.mulf %18, %20 : vector<8x128xf32>
    %c1 = arith.constant 1 : index
    %c0_10 = arith.constant 0 : index
    %22 = vector.load %arg3[%c1, %c0_10] : memref<2x128xf32, #tpu.memory_space<vmem>>, vector<1x128xf32>
    %23 = vector.broadcast %22 : vector<1x128xf32> to vector<8x128xf32>
    %24 = arith.addf %21, %23 : vector<8x128xf32>
    %c0_11 = arith.constant 0 : index
    %c0_12 = arith.constant 0 : index
    %25 = vector.load %arg4[%c0_11, %c0_12] : memref<8x128xf32, #tpu.memory_space<vmem>>, vector<8x128xf32>
    tpu.vector_store %arg4[%c0_11, %c0_12], %24 {strides = array<i32>} : memref<8x128xf32, #tpu.memory_space<vmem>>, vector<8x128xf32>,
    return
  }
  func.func @transform_0(%arg0: i32) -> (i32, i32) {
    %c0_i32 = arith.constant 0 : i32
    %c0_i32_0 = arith.constant 0 : i32
    %c0_i32_1 = arith.constant 0 : i32
    return %c0_i32, %c0_i32_0 : i32, i32
  }
  func.func @transform_1(%arg0: i32) -> (i32, i32) {
    %c0_i32 = arith.constant 0 : i32
    %c0_i32_0 = arith.constant 0 : i32
    return %c0_i32, %arg0 : i32, i32
  }
  func.func @transform_2(%arg0: i32) -> (i32, i32) {
    %c0_i32 = arith.constant 0 : i32
    %c0_i32_0 = arith.constant 0 : i32
    return %c0_i32, %arg0 : i32, i32
  }
  func.func @transform_3(%arg0: i32) -> (i32, i32) {
    %c0_i32 = arith.constant 0 : i32
    %c0_i32_0 = arith.constant 0 : i32
    return %c0_i32, %arg0 : i32, i32
  }
}

</mosaic_0001>

<bundles_post_ra>
// kernel: projection_mlp_forward.3
= control target key start
LH: loop header
LB: loop body
LE: loop exit
PB: predicated region body
PF: predicated region fallthrough
CT: control target
= control target key end

     0   :  { %8 = vsyncpa [#allocation3], 0  ;;  %s829_s0 = inlined_call_operand.vmem [shape: bf16[8,128], index: 0, kind: input, shape index: {}]   ;;  %s830_s1 = inlined_call_operand.hbm [shape: bf16[128,512], index: 1, kind: input, shape index: {}]   ;;  %s831_s2 = inlined_call_operand.vmem [shape: f32[2,512], index: 2, kind: input, shape index: {}]   ;;  %s832_s3 = inlined_call_operand.vmem [shape: bf16[8,512], index: 3, kind: output, shape index: {}]  }
   0x1   :  { %10 = vsyncpa [#allocation3 + $0x1], 0  ;;  %s707_s12 = smov 0   ;;  %s709_s13 = smov 0  }
   0x2   :  { %s711_s14 = smov 0   ;;  %s713_s15 = smov 0  }
   0x3 LB: > { %s512_s16 = sadd.s32 4294967295, %s680_s15   ;;  %s727_s17 = sadd.s32 1, %s680_s15   ;;  %s680_s15 = sphi %s713_s15, %s840_s15   ;;  %s676_s14 = sphi %s711_s14, %s839_s14   ;;  %s672_s13 = sphi %s709_s13, %s838_s13   ;;  %s668_s12 = sphi %s707_s12, %s837_s12  }
   0x4   : > { %s41_s18 = ssub.s32 %s680_s15, %s727_s17  ;;  %s44_s19 = sadd.s32 1, %s676_s14 }
   0x5   : > { %p42_p0 = scmp.eq.s32.totalorder %s41_s18, 0  ;;  %p51_p1 = scmp.ne.s32.totalorder %s676_s14, %s672_s13 }
   0x6   : > { %p52_p2 = scmp.eq.s32.totalorder %s680_s15, 0  ;;  %p57_p3 = scmp.ne.s32.totalorder %s672_s13, %s668_s12 }
   0x7   : > { %s737_s20 = scalar_select %p42_p0, %s676_s14, %s44_s19  }
   0x8   : > { %p53_p4 = por %p52_p2, %p51_p1  ;;  %p58_p5 = scmp.eq.s32.totalorder %s512_s16, 0 }
   0x9   : > { %p553_p6 = scmp.lt.s32.totalorder %s680_s15, 2  ;;  %s136_s22 = sand.u32 1, %s676_s14  }
   0xa   : > { %p742_p7 = por %p58_p5, %p57_p3  ;;  %s516_s23 = sshll.u32 %s136_s22, 7 }
   0xb   : > { %s545_s24 = sshll.u32 %s680_s15, 7  ;;  %s140_s28 = scalar_lea.vmem [#allocation2], %s516_s23 }
   0xc   : > { %s834_s21 = scalar_select %p742_p7, 1, 0 }
   0xd   : > { %s751_s27 = scalar_lea.hbm %s830_s1, %s545_s24  ;;  %s147_s29 = sshll.u32 %s140_s28, 4  ;;  %s753_s29 = int_to_ptr.vmem [resolvable:$true] %s147_s29 }
   0xe   : > { %p755_p8 = pnand %p553_p6, %p53_p4  ;;  %s759_s4 = scalar_lea.sflag [#allocation3], %s136_s22 }
   0xf   : > { %s618_s5 = scalar_lea.hbm %s751_s27, 2048  ;;  %s623_s8 = scalar_lea.hbm %s830_s1, 4096 }
  0x10   : > { %p619_p9 = scmp.ne.s32.totalorder %s751_s27, %s618_s5  ;;  %p620_p10 = pneg %p755_p8 }
  0x11   : > { %p624_p13 = scmp.lt.s32.totalorder %s751_s27, %s830_s1  ;;  %p625_p0 = scmp.lt.s32.totalorder %s623_s8, %s618_s5 }
  0x12   : > { %p621_p11 = pnand %p620_p10, %p619_p9 }
  0x13   : > { %p626_p1 = por %p625_p0, %p624_p13 }
  0x14   : > { %p622_p12 = pneg %p621_p11 }
  0x16   : > { %p627_p2 = pnand %p626_p1, %p622_p12 }
  0x18   : > { %630 = shalt.err (!%p627_p2)
}
  0x19   : > { %s631_s11 = scalar_lea.vmem %s753_s29, 2048  ;;  %s682_s12 = smov [#allocation2]  }
  0x1a   : > { %p632_p3 = scmp.ne.s32.totalorder %s753_s29, %s631_s11  ;;  %s636_s18 = sshll.u32 %s682_s12, 4  ;;  %s637_s18 = int_to_ptr.vmem [resolvable:$false] %s636_s18 }
  0x1b   : > { %s638_s19 = scalar_lea.vmem %s637_s18, 4096  ;;  %p639_p6 = scmp.lt.s32.totalorder %s753_s29, %s637_s18 }
  0x1c   : > { %p634_p4 = pnand %p632_p3, %p620_p10  ;;  %p640_p9 = scmp.lt.s32.totalorder %s638_s19, %s631_s11 }
  0x1e   : > { %p635_p5 = pneg %p634_p4  ;;  %p641_p11 = por %p640_p9, %p639_p6 }
  0x20   : > { %p642_p7 = pnand %p641_p11, %p635_p5 }
  0x22   : > { %645 = shalt.err (!%p642_p7)
}
  0x23   : > { %s683_s22 = smov 256   ;;  %s684_s23 = smov 128  }
  0x24   : > { %s685_s24 = smov 8   ;;  %p519_p10 = scmp.ge.s32.totalorder %s680_s15, 1 }
  0x25   : > { %552 = dma.hbm_to_vmem [thread:$0]  (!%p755_p8), %s751_s27, 2048, %s753_s29, %s759_s4, %s683_s22, %s684_s23, %s685_s24  }
  0x26   : > { %p164_p12 = scmp.lt.s32.totalorder %s680_s15, 3 }
  0x28   : > { %p165_p13 = pnand %p519_p10, %p164_p12 }
  0x29   : > { %s170_s25 = sand.u32 (!%p165_p13), 1, %s672_s13   ;;  %p836_p7 = scmp.ne.s32.totalorder (!%p165_p13), %s834_s21, 0 }
  0x2a   : > { %168 = sbr.rel (%p165_p13) target bundleno = 335 (0x14f), region = 32  ;;  %s520_s26 = sshll.u32 (!%p165_p13), %s170_s25, 7 }
  0x2b   : > { %s171_s28 = scalar_lea.sflag (!%p165_p13), [#allocation3], %s170_s25  ;;  %s783_s5 = scalar_lea.vmem (!%p165_p13), [#allocation2], %s520_s26 }
  0x2f   : > { %663 = dma.done.wait (%p836_p7), %s171_s28, 2048  }
  0x30   : > { %665 = vsyncadd (%p836_p7), %s171_s28, 4294965248  ;;  %v686_v0 = vmov 0   ;;  %v590_v1 = vld [vmem:[%s783_s5 + $0x74] ss:$8 sps:$4 sm:$0xff]   ;;  %v592_v2 = vld [vmem:[%s783_s5 + $0x70] ss:$8 sps:$4 sm:$0xff]   ;;  %v395_v55 = vlaneseq }
  0x31   : > { %345 = vmatprep.mubr.bf16.mxu0 %v686_v0  ;;  %313 = vmatprep.subr.bf16.mxu0 %v590_v1  ;;  %v593_v3 = vld [vmem:[%s783_s5 + $0x64] ss:$8 sps:$4 sm:$0xff]   ;;  %v595_v4 = vld [vmem:[%s783_s5 + $0x60] ss:$8 sps:$4 sm:$0xff]   ;;  %v596_v5 = vld [vmem:[%s783_s5 + $0x54] ss:$8 sps:$4 sm:$0xff]  }
  0x32   : > { %314 = vmatpush1.bf16.msra.mxu0 %v592_v2  ;;  %v598_v6 = vld [vmem:[%s783_s5 + $0x50] ss:$8 sps:$4 sm:$0xff]   ;;  %v599_v7 = vld [vmem:[%s783_s5 + $0x44] ss:$8 sps:$4 sm:$0xff]   ;;  %v601_v8 = vld [vmem:[%s783_s5 + $0x40] ss:$8 sps:$4 sm:$0xff]  }
  0x33   : > { %315 = vmatprep.subr.bf16.mxu0 %v593_v3  ;;  %v602_v9 = vld [vmem:[%s783_s5 + $0x34] ss:$8 sps:$4 sm:$0xff]   ;;  %v604_v10 = vld [vmem:[%s783_s5 + $0x30] ss:$8 sps:$4 sm:$0xff]   ;;  %v605_v11 = vld [vmem:[%s783_s5 + $0x24] ss:$8 sps:$4 sm:$0xff]  }
  0x34   : > { %v607_v12 = vld [vmem:[%s783_s5 + $0x20] ss:$8 sps:$4 sm:$0xff]   ;;  %v608_v13 = vld [vmem:[%s783_s5 + $0x14] ss:$8 sps:$4 sm:$0xff]   ;;  %v610_v14 = vld [vmem:[%s783_s5 + $0x10] ss:$8 sps:$4 sm:$0xff]  }
  0x35   : > { %v611_v15 = vld [vmem:[%s783_s5 + $0x4] ss:$8 sps:$4 sm:$0xff]   ;;  %v613_v16 = vld [vmem:[%s783_s5] ss:$8 sps:$4 sm:$0xff]   ;;  %s521_s29 = sshll.u32 %s512_s16, 1  ;;  %v396_v57 = vshrl.u32 %v395_v55, 7 }
  0x36   : > { %316 = vmatpush1.bf16.msra.mxu0 %v595_v4  ;;  %v216_v17 = vld [vmem:[%s829_s0] sm:$0xf]  ;;  %p204_p8 = scmp.lt.s32.totalorder %s521_s29, 3 }
  0x37   : > { %317 = vmatprep.subr.bf16.mxu0 %v596_v5  ;;  %v397_v58 = vsub.s32 0, %v396_v57  ;;  %v401_v60 = vsub.s32 1, %v396_v57 }
  0x38   : > { %s842_s29 = smov (!%p204_p8, %s521_s29), 3 }
  0x39   : > { %s522_s30 = sshll.u32 %s842_s29, 1  ;;  %s524_s16 = sshll.u32 %s842_s29, 2 }
  0x3a   : > { %318 = vmatpush1.bf16.msra.mxu0 %v598_v6  ;;  %s207_s15 = scalar_lea.vmem %s831_s2, %s522_s30  ;;  %s213_s9 = scalar_lea.vmem %s832_s3, %s524_s16 }
  0x3b   : > { %319 = vmatprep.subr.bf16.mxu0 %v599_v7  ;;  %v393_v59 = vld [vmem:[%s207_s15] ss:$2 sm:$0x3]  ;;  %v541_v61 = vld [vmem:[%s207_s15 + $0x1] ss:$2 sm:$0x3] }
  0x3c   : > { %v398_v62 = vrot.slane %v393_v59, %v397_v58  ;;  %v413_v1 = vrot.slane %v541_v61, %v397_v58  ;;  %v402_v2 = vrot.slane %v393_v59, %v401_v60  ;;  %v417_v6 = vrot.slane %v541_v61, %v401_v60 }
  0x3e   : > { %320 = vmatpush1.bf16.msra.mxu0 %v601_v8 }
  0x3f   : > { %321 = vmatprep.subr.bf16.mxu0 %v602_v9 }
  0x42   : > { %322 = vmatpush1.bf16.msra.mxu0 %v604_v10 }
  0x43   : > { %323 = vmatprep.subr.bf16.mxu0 %v605_v11 }
  0x46   : > { %324 = vmatpush1.bf16.msra.mxu0 %v607_v12 }
  0x47   : > { %325 = vmatprep.subr.bf16.mxu0 %v608_v13 }
  0x4a   : > { %326 = vmatpush1.bf16.msra.mxu0 %v610_v14 }
  0x4b   : > { %327 = vmatprep.subr.bf16.mxu0 %v611_v15 }
  0x4e   : > { %328 = vmatpush1.bf16.msra.mxu0 %v613_v16 }
  0x51   : > { %346 = vmatmul.mubr.bf16.vlgmr.msra.gmra.mxu0 %v216_v17 }
 0x111   : > { %v347_v18 = vpop.f32.mrf.mxu0 }
 0x112   : > { %v354_v19 = vrot.slane %v347_v18, 4 }
 0x113   : > { %v349_v20 = vpop.f32.mrf.mxu0 }
 0x114   : > { %v355_v21 = vadd.f32 %v354_v19, %v347_v18  ;;  %v360_v22 = vrot.slane %v349_v20, 4 }
 0x115   : > { %v351_v23 = vpop.f32.mrf.mxu0 }
 0x116   : > { %v356_v24 = vrot.slane %v355_v21, 2  ;;  %v361_v25 = vadd.f32 %v360_v22, %v349_v20 }
 0x117   : > { %v352_v26 = vpop.f32.mrf.mxu0 }
 0x118   : > { %v357_v27 = vadd.f32 %v356_v24, %v355_v21  ;;  %v362_v28 = vrot.slane %v361_v25, 2 }
 0x11a   : > { %v358_v29 = vrot.slane %v357_v27, 1  ;;  %v363_v30 = vadd.f32 %v362_v28, %v361_v25 }
 0x11c   : > { %v359_v31 = vadd.f32 %v358_v29, %v357_v27  ;;  %v364_v32 = vrot.slane %v363_v30, 1 }
 0x11e   : > { %v367_v33 = vmul.f32 0.125, %v359_v31  ;;  %v365_v34 = vadd.f32 %v364_v32, %v363_v30 }
 0x120   : > { %v369_v35 = vsub.f32 %v347_v18, %v367_v33  ;;  %v368_v36 = vmul.f32 0.125, %v365_v34 }
 0x122   : > { %v371_v37 = vmul.f32 %v369_v35, %v369_v35  ;;  %v370_v38 = vsub.f32 %v349_v20, %v368_v36 }
 0x124   : > { %v373_v39 = vrot.slane %v371_v37, 4  ;;  %v372_v40 = vmul.f32 %v370_v38, %v370_v38 }
 0x126   : > { %v374_v41 = vadd.f32 %v373_v39, %v371_v37  ;;  %v379_v42 = vrot.slane %v372_v40, 4 }
 0x128   : > { %v375_v43 = vrot.slane %v374_v41, 2  ;;  %v380_v44 = vadd.f32 %v379_v42, %v372_v40 }
 0x12a   : > { %v376_v45 = vadd.f32 %v375_v43, %v374_v41  ;;  %v381_v46 = vrot.slane %v380_v44, 2 }
 0x12c   : > { %v377_v47 = vrot.slane %v376_v45, 1  ;;  %v382_v48 = vadd.f32 %v381_v46, %v380_v44 }
 0x12e   : > { %v378_v49 = vadd.f32 %v377_v47, %v376_v45  ;;  %v383_v50 = vrot.slane %v382_v48, 1 }
 0x130   : > { %v385_v51 = vmul.f32 0.125, %v378_v49  ;;  %v384_v52 = vadd.f32 %v383_v50, %v382_v48 }
 0x132   : > { %v387_v53 = vadd.f32 1e-05, %v385_v51  ;;  %v386_v54 = vmul.f32 0.125, %v384_v52 }
 0x134   : > { %614 = vrsqrt.f32 %v387_v53  ;;  %v388_v56 = vadd.f32 1e-05, %v386_v54 }
 0x136   : > { %616 = vrsqrt.f32 %v388_v56 }
 0x141   : > { %v615_v63 = vpop.eup %614 }
 0x142   : > { %v391_v0 = vmul.f32 %v615_v63, %v369_v35 }
 0x143   : > { %v617_v3 = vpop.eup %616 }
 0x144   : > { %v405_v4 = vmul.f32 %v398_v62, %v391_v0  ;;  %v392_v5 = vmul.f32 %v617_v3, %v370_v38 }
 0x146   : > { %v420_v7 = vadd.f32 %v413_v1, %v405_v4  ;;  %v406_v8 = vmul.f32 %v402_v2, %v392_v5 }
 0x148   : > { %v421_v9 = vadd.f32 %v417_v6, %v406_v8  ;;  %v422_v10 = vmax.f32 %v420_v7, 0.0 }
 0x14a   : > { %v423_v11 = vmax.f32 %v421_v9, 0.0 }
 0x14c   : > { %v546_v12 = vpack.c.bf16 %v423_v11, %v422_v10 }
 0x14e   : > { %432 = vst [vmem:[%s213_s9] sm:$0xff] %v546_v12 }
 0x14f PF: > { %p13_p0 = scmp.ge.s32.totalorder %s727_s17, 4   ;;  %s837_s12 = smov %s672_s13 }
 0x150   : > { %s838_s13 = smov %s676_s14  ;;  %s839_s14 = smov %s737_s20 }
 0x151   : > { %s840_s15 = smov %s727_s17  ;;  %15 = sbr.rel (!%p13_p0) target bundleno = 3 (0x3), region = 76 }
 0x156   :  { %455 = vsyncpa [#allocation3], 1 }
 0x157   :  { %457 = vsyncpa [#allocation3 + $0x1], 1 }

// kernel: projection_mlp_forward.4
= control target key start
LH: loop header
LB: loop body
LE: loop exit
PB: predicated region body
PF: predicated region fallthrough
CT: control target
= control target key end

     0   :  { %8 = vsyncpa [#allocation3], 0  ;;  %s1349_s0 = inlined_call_operand.vmem [shape: bf16[8,512], index: 0, kind: input, shape index: {}]   ;;  %s1350_s1 = inlined_call_operand.hbm [shape: bf16[512,512], index: 1, kind: input, shape index: {}]   ;;  %s1351_s2 = inlined_call_operand.vmem [shape: f32[2,512], index: 2, kind: input, shape index: {}]   ;;  %s1352_s3 = inlined_call_operand.vmem [shape: bf16[8,512], index: 3, kind: output, shape index: {}]  }
   0x1   :  { %10 = vsyncpa [#allocation3 + $0x1], 0  ;;  %s1176_s12 = smov 0   ;;  %s1178_s13 = smov 0  }
   0x2   :  { %s1180_s14 = smov 0   ;;  %s1182_s15 = smov 0  }
   0x3 LB: > { %s855_s16 = sadd.s32 4294967295, %s1150_s15   ;;  %s1196_s17 = sadd.s32 1, %s1150_s15   ;;  %s1150_s15 = sphi %s1182_s15, %s1360_s15   ;;  %s1146_s14 = sphi %s1180_s14, %s1359_s14   ;;  %s1142_s13 = sphi %s1178_s13, %s1358_s13   ;;  %s1138_s12 = sphi %s1176_s12, %s1357_s12  }
   0x4   : > { %s41_s18 = ssub.s32 %s1150_s15, %s1196_s17  ;;  %s44_s19 = sadd.s32 1, %s1146_s14 }
   0x5   : > { %p42_p0 = scmp.eq.s32.totalorder %s41_s18, 0  ;;  %p51_p1 = scmp.ne.s32.totalorder %s1146_s14, %s1142_s13 }
   0x6   : > { %p52_p2 = scmp.eq.s32.totalorder %s1150_s15, 0  ;;  %p57_p3 = scmp.ne.s32.totalorder %s1142_s13, %s1138_s12 }
   0x7   : > { %s1206_s20 = scalar_select %p42_p0, %s1146_s14, %s44_s19  }
   0x8   : > { %p53_p4 = por %p52_p2, %p51_p1  ;;  %p58_p5 = scmp.eq.s32.totalorder %s855_s16, 0 }
   0x9   : > { %p948_p6 = scmp.lt.s32.totalorder %s1150_s15, 2  ;;  %s136_s22 = sand.u32 1, %s1146_s14  }
   0xa   : > { %p1211_p7 = por %p58_p5, %p57_p3  ;;  %s859_s23 = sshll.u32 %s136_s22, 9 }
   0xb   : > { %s940_s24 = sshll.u32 %s1150_s15, 7  ;;  %s140_s28 = scalar_lea.vmem [#allocation2], %s859_s23 }
   0xc   : > { %s1354_s21 = scalar_select %p1211_p7, 1, 0 }
   0xd   : > { %s1220_s27 = scalar_lea.hbm %s1350_s1, %s940_s24  ;;  %s147_s29 = sshll.u32 %s140_s28, 4  ;;  %s1222_s29 = int_to_ptr.vmem [resolvable:$true] %s147_s29 }
   0xe   : > { %p1224_p8 = pnand %p948_p6, %p53_p4  ;;  %s1228_s4 = scalar_lea.sflag [#allocation3], %s136_s22 }
   0xf   : > { %s1088_s5 = scalar_lea.hbm %s1220_s27, 8192  ;;  %s1093_s8 = scalar_lea.hbm %s1350_s1, 16384 }
  0x10   : > { %p1089_p9 = scmp.ne.s32.totalorder %s1220_s27, %s1088_s5  ;;  %p1090_p10 = pneg %p1224_p8 }
  0x11   : > { %p1094_p13 = scmp.lt.s32.totalorder %s1220_s27, %s1350_s1  ;;  %p1095_p0 = scmp.lt.s32.totalorder %s1093_s8, %s1088_s5 }
  0x12   : > { %p1091_p11 = pnand %p1090_p10, %p1089_p9 }
  0x13   : > { %p1096_p1 = por %p1095_p0, %p1094_p13 }
  0x14   : > { %p1092_p12 = pneg %p1091_p11 }
  0x16   : > { %p1097_p2 = pnand %p1096_p1, %p1092_p12 }
  0x18   : > { %1100 = shalt.err (!%p1097_p2)
}
  0x19   : > { %s1101_s11 = scalar_lea.vmem %s1222_s29, 8192  ;;  %s1152_s12 = smov [#allocation2]  }
  0x1a   : > { %p1102_p3 = scmp.ne.s32.totalorder %s1222_s29, %s1101_s11  ;;  %s1106_s18 = sshll.u32 %s1152_s12, 4  ;;  %s1107_s18 = int_to_ptr.vmem [resolvable:$false] %s1106_s18 }
  0x1b   : > { %s1108_s19 = scalar_lea.vmem %s1107_s18, 16384  ;;  %p1109_p6 = scmp.lt.s32.totalorder %s1222_s29, %s1107_s18 }
  0x1c   : > { %p1104_p4 = pnand %p1102_p3, %p1090_p10  ;;  %p1110_p9 = scmp.lt.s32.totalorder %s1108_s19, %s1101_s11 }
  0x1e   : > { %p1105_p5 = pneg %p1104_p4  ;;  %p1111_p11 = por %p1110_p9, %p1109_p6 }
  0x20   : > { %p1112_p7 = pnand %p1111_p11, %p1105_p5 }
  0x22   : > { %1115 = shalt.err (!%p1112_p7)
}
  0x23   : > { %s1153_s22 = smov 256   ;;  %s1154_s23 = smov 128  }
  0x24   : > { %s1155_s24 = smov 8   ;;  %p862_p10 = scmp.ge.s32.totalorder %s1150_s15, 1 }
  0x25   : > { %947 = dma.hbm_to_vmem [thread:$0]  (!%p1224_p8), %s1220_s27, 8192, %s1222_s29, %s1228_s4, %s1153_s22, %s1154_s23, %s1155_s24  }
  0x26   : > { %p164_p12 = scmp.lt.s32.totalorder %s1150_s15, 3 }
  0x28   : > { %p165_p13 = pnand %p862_p10, %p164_p12 }
  0x29   : > { %s170_s25 = sand.u32 (!%p165_p13), 1, %s1142_s13   ;;  %p1356_p7 = scmp.ne.s32.totalorder (!%p165_p13), %s1354_s21, 0 }
  0x2a   : > { %168 = sbr.rel (%p165_p13) target bundleno = 370 (0x172), region = 32  ;;  %s863_s26 = sshll.u32 (!%p165_p13), %s170_s25, 9 }
  0x2b   : > { %s171_s28 = scalar_lea.sflag (!%p165_p13), [#allocation3], %s170_s25  ;;  %s1252_s5 = scalar_lea.vmem (!%p165_p13), [#allocation2], %s863_s26 }
  0x2f   : > { %1133 = dma.done.wait (%p1356_p7), %s171_s28, 8192  }
  0x30   : > { %1135 = vsyncadd (%p1356_p7), %s171_s28, 4294959104  ;;  %v984_v0 = vld [vmem:[%s1252_s5 + $0x74] ss:$8 sps:$4 sm:$0xff]   ;;  %v988_v2 = vld [vmem:[%s1252_s5 + $0x70] ss:$8 sps:$4 sm:$0xff]   ;;  %s864_s4 = sshll.u32 %s855_s16, 1 }
  0x31   : > { %v986_v1 = vld [vmem:[%s1252_s5 + $0x174] ss:$8 sps:$4 sm:$0xff]   ;;  %615 = vmatprep.subr.bf16.mxu0 %v984_v0  ;;  %v989_v3 = vld [vmem:[%s1252_s5 + $0x170] ss:$8 sps:$4 sm:$0xff]   ;;  %v990_v4 = vld [vmem:[%s1252_s5 + $0x64] ss:$8 sps:$4 sm:$0xff]  }
  0x32   : > { %656 = vmatprep.subr.bf16.mxu1 %v986_v1  ;;  %616 = vmatpush1.bf16.msra.mxu0 %v988_v2  ;;  %v992_v5 = vld [vmem:[%s1252_s5 + $0x164] ss:$8 sps:$4 sm:$0xff]   ;;  %v994_v6 = vld [vmem:[%s1252_s5 + $0x60] ss:$8 sps:$4 sm:$0xff]   ;;  %v996_v8 = vld [vmem:[%s1252_s5 + $0x54] ss:$8 sps:$4 sm:$0xff]  }
  0x33   : > { %657 = vmatpush1.bf16.msra.mxu1 %v989_v3  ;;  %617 = vmatprep.subr.bf16.mxu0 %v990_v4  ;;  %v995_v7 = vld [vmem:[%s1252_s5 + $0x160] ss:$8 sps:$4 sm:$0xff]   ;;  %v998_v9 = vld [vmem:[%s1252_s5 + $0x154] ss:$8 sps:$4 sm:$0xff]   ;;  %v1000_v10 = vld [vmem:[%s1252_s5 + $0x50] ss:$8 sps:$4 sm:$0xff]  }
  0x34   : > { %658 = vmatprep.subr.bf16.mxu1 %v992_v5  ;;  %v1001_v11 = vld [vmem:[%s1252_s5 + $0x150] ss:$8 sps:$4 sm:$0xff]   ;;  %v1002_v12 = vld [vmem:[%s1252_s5 + $0x44] ss:$8 sps:$4 sm:$0xff]   ;;  %v1006_v14 = vld [vmem:[%s1252_s5 + $0x40] ss:$8 sps:$4 sm:$0xff]  }
  0x35   : > { %v1004_v13 = vld [vmem:[%s1252_s5 + $0x144] ss:$8 sps:$4 sm:$0xff]   ;;  %v1007_v15 = vld [vmem:[%s1252_s5 + $0x140] ss:$8 sps:$4 sm:$0xff]   ;;  %v1008_v16 = vld [vmem:[%s1252_s5 + $0x34] ss:$8 sps:$4 sm:$0xff]  }
  0x36   : > { %618 = vmatpush1.bf16.msra.mxu0 %v994_v6  ;;  %v1010_v17 = vld [vmem:[%s1252_s5 + $0x134] ss:$8 sps:$4 sm:$0xff]   ;;  %v1012_v18 = vld [vmem:[%s1252_s5 + $0x30] ss:$8 sps:$4 sm:$0xff]   ;;  %v1014_v20 = vld [vmem:[%s1252_s5 + $0x24] ss:$8 sps:$4 sm:$0xff]  }
  0x37   : > { %659 = vmatpush1.bf16.msra.mxu1 %v995_v7  ;;  %619 = vmatprep.subr.bf16.mxu0 %v996_v8  ;;  %v1013_v19 = vld [vmem:[%s1252_s5 + $0x130] ss:$8 sps:$4 sm:$0xff]   ;;  %v1016_v21 = vld [vmem:[%s1252_s5 + $0x124] ss:$8 sps:$4 sm:$0xff]   ;;  %v1018_v22 = vld [vmem:[%s1252_s5 + $0x20] ss:$8 sps:$4 sm:$0xff]  }
  0x38   : > { %660 = vmatprep.subr.bf16.mxu1 %v998_v9  ;;  %v1019_v23 = vld [vmem:[%s1252_s5 + $0x120] ss:$8 sps:$4 sm:$0xff]   ;;  %v1020_v24 = vld [vmem:[%s1252_s5 + $0x14] ss:$8 sps:$4 sm:$0xff]   ;;  %v1024_v26 = vld [vmem:[%s1252_s5 + $0x10] ss:$8 sps:$4 sm:$0xff]  }
  0x39   : > { %v1022_v25 = vld [vmem:[%s1252_s5 + $0x114] ss:$8 sps:$4 sm:$0xff]   ;;  %v1025_v27 = vld [vmem:[%s1252_s5 + $0x110] ss:$8 sps:$4 sm:$0xff]   ;;  %v1026_v28 = vld [vmem:[%s1252_s5 + $0x4] ss:$8 sps:$4 sm:$0xff]  }
  0x3a   : > { %620 = vmatpush1.bf16.msra.mxu0 %v1000_v10  ;;  %v1028_v29 = vld [vmem:[%s1252_s5 + $0x104] ss:$8 sps:$4 sm:$0xff]   ;;  %v1030_v30 = vld [vmem:[%s1252_s5] ss:$8 sps:$4 sm:$0xff]   ;;  %v1032_v32 = vld [vmem:[%s1252_s5 + $0xf4] ss:$8 sps:$4 sm:$0xff]  }
  0x3b   : > { %661 = vmatpush1.bf16.msra.mxu1 %v1001_v11  ;;  %621 = vmatprep.subr.bf16.mxu0 %v1002_v12  ;;  %v1031_v31 = vld [vmem:[%s1252_s5 + $0x100] ss:$8 sps:$4 sm:$0xff]   ;;  %v1034_v33 = vld [vmem:[%s1252_s5 + $0x1f4] ss:$8 sps:$4 sm:$0xff]   ;;  %v1036_v34 = vld [vmem:[%s1252_s5 + $0xf0] ss:$8 sps:$4 sm:$0xff]  }
  0x3c   : > { %662 = vmatprep.subr.bf16.mxu1 %v1004_v13  ;;  %v1037_v35 = vld [vmem:[%s1252_s5 + $0x1f0] ss:$8 sps:$4 sm:$0xff]   ;;  %v1038_v36 = vld [vmem:[%s1252_s5 + $0xe4] ss:$8 sps:$4 sm:$0xff]   ;;  %v1042_v38 = vld [vmem:[%s1252_s5 + $0xe0] ss:$8 sps:$4 sm:$0xff]  }
  0x3d   : > { %v1040_v37 = vld [vmem:[%s1252_s5 + $0x1e4] ss:$8 sps:$4 sm:$0xff]   ;;  %v1043_v39 = vld [vmem:[%s1252_s5 + $0x1e0] ss:$8 sps:$4 sm:$0xff]   ;;  %v1044_v40 = vld [vmem:[%s1252_s5 + $0xd4] ss:$8 sps:$4 sm:$0xff]  }
  0x3e   : > { %622 = vmatpush1.bf16.msra.mxu0 %v1006_v14  ;;  %v1046_v41 = vld [vmem:[%s1252_s5 + $0x1d4] ss:$8 sps:$4 sm:$0xff]   ;;  %v1048_v42 = vld [vmem:[%s1252_s5 + $0xd0] ss:$8 sps:$4 sm:$0xff]   ;;  %v1050_v44 = vld [vmem:[%s1252_s5 + $0xc4] ss:$8 sps:$4 sm:$0xff]  }
  0x3f   : > { %663 = vmatpush1.bf16.msra.mxu1 %v1007_v15  ;;  %623 = vmatprep.subr.bf16.mxu0 %v1008_v16  ;;  %v1049_v43 = vld [vmem:[%s1252_s5 + $0x1d0] ss:$8 sps:$4 sm:$0xff]   ;;  %v1052_v45 = vld [vmem:[%s1252_s5 + $0x1c4] ss:$8 sps:$4 sm:$0xff]   ;;  %v1054_v49 = vld [vmem:[%s1252_s5 + $0xc0] ss:$8 sps:$4 sm:$0xff]  }
  0x40   : > { %664 = vmatprep.subr.bf16.mxu1 %v1010_v17  ;;  %v215_v46 = vld [vmem:[%s1349_s0] sm:$0xff]  ;;  %v216_v48 = vld [vmem:[%s1349_s0 + $0x8] sm:$0xff]  ;;  %v1056_v52 = vld [vmem:[%s1252_s5 + $0xb4] ss:$8 sps:$4 sm:$0xff]   ;;  %p204_p8 = scmp.lt.s32.totalorder %s864_s4, 3 }
  0x41   : > { %v869_v47 = vcombine.high %v215_v46, %v215_v46  ;;  %v1055_v50 = vld [vmem:[%s1252_s5 + $0x1c0] ss:$8 sps:$4 sm:$0xff]   ;;  %v871_v51 = vcombine.high %v216_v48, %v216_v48  ;;  %v1058_v53 = vld [vmem:[%s1252_s5 + $0x1b4] ss:$8 sps:$4 sm:$0xff]   ;;  %v1060_v54 = vld [vmem:[%s1252_s5 + $0xb0] ss:$8 sps:$4 sm:$0xff]   ;;  %v868_v4 = vcombine.low %v215_v46, %v215_v46  ;;  %v870_v5 = vcombine.low %v216_v48, %v216_v48 }
  0x42   : > { %624 = vmatpush1.bf16.msra.mxu0 %v1012_v18  ;;  %v1061_v55 = vld [vmem:[%s1252_s5 + $0x1b0] ss:$8 sps:$4 sm:$0xff]   ;;  %v1062_v56 = vld [vmem:[%s1252_s5 + $0xa4] ss:$8 sps:$4 sm:$0xff]   ;;  %v1066_v58 = vld [vmem:[%s1252_s5 + $0xa0] ss:$8 sps:$4 sm:$0xff]  }
  0x43   : > { %665 = vmatpush1.bf16.msra.mxu1 %v1013_v19  ;;  %625 = vmatprep.subr.bf16.mxu0 %v1014_v20  ;;  %v1064_v57 = vld [vmem:[%s1252_s5 + $0x1a4] ss:$8 sps:$4 sm:$0xff]   ;;  %v1067_v59 = vld [vmem:[%s1252_s5 + $0x1a0] ss:$8 sps:$4 sm:$0xff]   ;;  %v1068_v60 = vld [vmem:[%s1252_s5 + $0x94] ss:$8 sps:$4 sm:$0xff]  }
  0x44   : > { %666 = vmatprep.subr.bf16.mxu1 %v1016_v21  ;;  %647 = vmatprep.mubr.bf16.mxu0 %v869_v47  ;;  %v1070_v61 = vld [vmem:[%s1252_s5 + $0x194] ss:$8 sps:$4 sm:$0xff]   ;;  %v1072_v62 = vld [vmem:[%s1252_s5 + $0x90] ss:$8 sps:$4 sm:$0xff]   ;;  %v1074_v0 = vld [vmem:[%s1252_s5 + $0x84] ss:$8 sps:$4 sm:$0xff]  }
  0x45   : > { %688 = vmatprep.mubr.bf16.mxu1 %v871_v51  ;;  %v1073_v63 = vld [vmem:[%s1252_s5 + $0x190] ss:$8 sps:$4 sm:$0xff]   ;;  %v1076_v1 = vld [vmem:[%s1252_s5 + $0x184] ss:$8 sps:$4 sm:$0xff]   ;;  %v1078_v2 = vld [vmem:[%s1252_s5 + $0x80] ss:$8 sps:$4 sm:$0xff]  }
  0x46   : > { %626 = vmatpush1.bf16.msra.mxu0 %v1018_v22  ;;  %v1079_v3 = vld [vmem:[%s1252_s5 + $0x180] ss:$8 sps:$4 sm:$0xff]   ;;  %s1362_s4 = smov (!%p204_p8, %s864_s4), 3 }
  0x47   : > { %667 = vmatpush1.bf16.msra.mxu1 %v1019_v23  ;;  %627 = vmatprep.subr.bf16.mxu0 %v1020_v24  ;;  %s865_s6 = sshll.u32 %s1362_s4, 1  ;;  %s867_s16 = sshll.u32 %s1362_s4, 2 }
  0x48   : > { %668 = vmatprep.subr.bf16.mxu1 %v1022_v25  ;;  %s207_s15 = scalar_lea.vmem %s1351_s2, %s865_s6  ;;  %s213_s11 = scalar_lea.vmem %s1352_s3, %s867_s16 }
  0x4a   : > { %628 = vmatpush1.bf16.msra.mxu0 %v1024_v26 }
  0x4b   : > { %669 = vmatpush1.bf16.msra.mxu1 %v1025_v27  ;;  %629 = vmatprep.subr.bf16.mxu0 %v1026_v28 }
  0x4c   : > { %670 = vmatprep.subr.bf16.mxu1 %v1028_v29 }
  0x4e   : > { %630 = vmatpush1.bf16.msra.mxu0 %v1030_v30 }
  0x4f   : > { %671 = vmatpush1.bf16.msra.mxu1 %v1031_v31  ;;  %631 = vmatprep.subr.bf16.mxu0 %v1032_v32 }
  0x50   : > { %672 = vmatprep.subr.bf16.mxu1 %v1034_v33 }
  0x52   : > { %632 = vmatpush2.bf16.msra.mxu0 %v1036_v34 }
  0x53   : > { %673 = vmatpush2.bf16.msra.mxu1 %v1037_v35  ;;  %633 = vmatprep.subr.bf16.mxu0 %v1038_v36 }
  0x54   : > { %674 = vmatprep.subr.bf16.mxu1 %v1040_v37 }
  0x56   : > { %634 = vmatpush2.bf16.msra.mxu0 %v1042_v38 }
  0x57   : > { %675 = vmatpush2.bf16.msra.mxu1 %v1043_v39  ;;  %635 = vmatprep.subr.bf16.mxu0 %v1044_v40 }
  0x58   : > { %676 = vmatprep.subr.bf16.mxu1 %v1046_v41 }
  0x5a   : > { %636 = vmatpush2.bf16.msra.mxu0 %v1048_v42 }
  0x5b   : > { %677 = vmatpush2.bf16.msra.mxu1 %v1049_v43  ;;  %637 = vmatprep.subr.bf16.mxu0 %v1050_v44 }
  0x5c   : > { %678 = vmatprep.subr.bf16.mxu1 %v1052_v45 }
  0x5e   : > { %638 = vmatpush2.bf16.msra.mxu0 %v1054_v49  ;;  %v738_v49 = vlaneseq }
  0x5f   : > { %679 = vmatpush2.bf16.msra.mxu1 %v1055_v50  ;;  %639 = vmatprep.subr.bf16.mxu0 %v1056_v52 }
  0x60   : > { %680 = vmatprep.subr.bf16.mxu1 %v1058_v53  ;;  %v739_v51 = vshrl.u32 %v738_v49, 7  ;;  %v736_v53 = vld [vmem:[%s207_s15] ss:$2 sm:$0x3] }
  0x62   : > { %640 = vmatpush2.bf16.msra.mxu0 %v1060_v54  ;;  %v740_v52 = vsub.s32 0, %v739_v51  ;;  %v744_v54 = vsub.s32 1, %v739_v51 }
  0x63   : > { %681 = vmatpush2.bf16.msra.mxu1 %v1061_v55  ;;  %641 = vmatprep.subr.bf16.mxu0 %v1062_v56  ;;  %v936_v55 = vld [vmem:[%s207_s15 + $0x1] ss:$2 sm:$0x3] }
  0x64   : > { %682 = vmatprep.subr.bf16.mxu1 %v1064_v57  ;;  %v741_v56 = vrot.slane %v736_v53, %v740_v52 }
  0x66   : > { %642 = vmatpush2.bf16.msra.mxu0 %v1066_v58 }
  0x67   : > { %683 = vmatpush2.bf16.msra.mxu1 %v1067_v59  ;;  %643 = vmatprep.subr.bf16.mxu0 %v1068_v60  ;;  %v756_v59 = vrot.slane %v936_v55, %v740_v52  ;;  %v745_v60 = vrot.slane %v736_v53, %v744_v54 }
  0x68   : > { %684 = vmatprep.subr.bf16.mxu1 %v1070_v61 }
  0x6a   : > { %644 = vmatpush2.bf16.msra.mxu0 %v1072_v62 }
  0x6b   : > { %685 = vmatpush2.bf16.msra.mxu1 %v1073_v63  ;;  %645 = vmatprep.subr.bf16.mxu0 %v1074_v0  ;;  %v760_v0 = vrot.slane %v936_v55, %v744_v54 }
  0x6c   : > { %686 = vmatprep.subr.bf16.mxu1 %v1076_v1 }
  0x6e   : > { %646 = vmatpush2.bf16.msra.mxu0 %v1078_v2 }
  0x6f   : > { %687 = vmatpush2.bf16.msra.mxu1 %v1079_v3 }
  0x71   : > { %648 = vmatmul.mubr.bf16.vlgmr.msra.gmra.mxu0 %v868_v4 }
  0x72   : > { %689 = vmatmul.mubr.bf16.vlgmr.msra.gmra.mxu1 %v870_v5 }
 0x131   : > { %v649_v6 = vpop.f32.mrf.mxu0 }
 0x132   : > { %v690_v7 = vpop.f32.mrf.mxu1 }
 0x133   : > { %v691_v8 = vadd.f32 %v690_v7, %v649_v6  ;;  %v651_v9 = vpop.f32.mrf.mxu0 }
 0x134   : > { %v692_v10 = vpop.f32.mrf.mxu1 }
 0x135   : > { %v697_v11 = vrot.slane %v691_v8, 4  ;;  %v693_v12 = vadd.f32 %v692_v10, %v651_v9  ;;  %v653_v13 = vpop.f32.mrf.mxu0 }
 0x136   : > { %v694_v14 = vpop.f32.mrf.mxu1 }
 0x137   : > { %v698_v15 = vadd.f32 %v697_v11, %v691_v8  ;;  %v703_v16 = vrot.slane %v693_v12, 4  ;;  %v654_v17 = vpop.f32.mrf.mxu0 }
 0x138   : > { %v695_v18 = vpop.f32.mrf.mxu1 }
 0x139   : > { %v699_v19 = vrot.slane %v698_v15, 2  ;;  %v704_v20 = vadd.f32 %v703_v16, %v693_v12 }
 0x13b   : > { %v700_v21 = vadd.f32 %v699_v19, %v698_v15  ;;  %v705_v22 = vrot.slane %v704_v20, 2 }
 0x13d   : > { %v701_v23 = vrot.slane %v700_v21, 1  ;;  %v706_v24 = vadd.f32 %v705_v22, %v704_v20 }
 0x13f   : > { %v702_v25 = vadd.f32 %v701_v23, %v700_v21  ;;  %v707_v26 = vrot.slane %v706_v24, 1 }
 0x141   : > { %v710_v27 = vmul.f32 0.125, %v702_v25  ;;  %v708_v28 = vadd.f32 %v707_v26, %v706_v24 }
 0x143   : > { %v712_v29 = vsub.f32 %v691_v8, %v710_v27  ;;  %v711_v30 = vmul.f32 0.125, %v708_v28 }
 0x145   : > { %v714_v31 = vmul.f32 %v712_v29, %v712_v29  ;;  %v713_v32 = vsub.f32 %v693_v12, %v711_v30 }
 0x147   : > { %v716_v33 = vrot.slane %v714_v31, 4  ;;  %v715_v34 = vmul.f32 %v713_v32, %v713_v32 }
 0x149   : > { %v717_v35 = vadd.f32 %v716_v33, %v714_v31  ;;  %v722_v36 = vrot.slane %v715_v34, 4 }
 0x14b   : > { %v718_v37 = vrot.slane %v717_v35, 2  ;;  %v723_v38 = vadd.f32 %v722_v36, %v715_v34 }
 0x14d   : > { %v719_v39 = vadd.f32 %v718_v37, %v717_v35  ;;  %v724_v40 = vrot.slane %v723_v38, 2 }
 0x14f   : > { %v720_v41 = vrot.slane %v719_v39, 1  ;;  %v725_v42 = vadd.f32 %v724_v40, %v723_v38 }
 0x151   : > { %v721_v43 = vadd.f32 %v720_v41, %v719_v39  ;;  %v726_v44 = vrot.slane %v725_v42, 1 }
 0x153   : > { %v728_v45 = vmul.f32 0.125, %v721_v43  ;;  %v727_v46 = vadd.f32 %v726_v44, %v725_v42 }
 0x155   : > { %v730_v47 = vadd.f32 1e-05, %v728_v45  ;;  %v729_v48 = vmul.f32 0.125, %v727_v46 }
 0x157   : > { %1084 = vrsqrt.f32 %v730_v47  ;;  %v731_v50 = vadd.f32 1e-05, %v729_v48 }
 0x159   : > { %1086 = vrsqrt.f32 %v731_v50 }
 0x164   : > { %v1085_v57 = vpop.eup %1084 }
 0x165   : > { %v734_v58 = vmul.f32 %v1085_v57, %v712_v29 }
 0x166   : > { %v1087_v61 = vpop.eup %1086 }
 0x167   : > { %v748_v62 = vmul.f32 %v741_v56, %v734_v58  ;;  %v735_v63 = vmul.f32 %v1087_v61, %v713_v32 }
 0x169   : > { %v763_v1 = vadd.f32 %v756_v59, %v748_v62  ;;  %v749_v2 = vmul.f32 %v745_v60, %v735_v63 }
 0x16b   : > { %v764_v3 = vadd.f32 %v760_v0, %v749_v2  ;;  %v765_v4 = vmax.f32 %v763_v1, 0.0 }
 0x16d   : > { %v766_v5 = vmax.f32 %v764_v3, 0.0 }
 0x16f   : > { %v941_v6 = vpack.c.bf16 %v766_v5, %v765_v4 }
 0x171   : > { %775 = vst [vmem:[%s213_s11] sm:$0xff] %v941_v6 }
 0x172 PF: > { %p13_p0 = scmp.ge.s32.totalorder %s1196_s17, 4   ;;  %s1357_s12 = smov %s1142_s13 }
 0x173   : > { %s1358_s13 = smov %s1146_s14  ;;  %s1359_s14 = smov %s1206_s20 }
 0x174   : > { %s1360_s15 = smov %s1196_s17  ;;  %15 = sbr.rel (!%p13_p0) target bundleno = 3 (0x3), region = 76 }
 0x179   :  { %798 = vsyncpa [#allocation3], 1 }
 0x17a   :  { %800 = vsyncpa [#allocation3 + $0x1], 1 }

// kernel: projection_mlp_forward.5
= control target key start
LH: loop header
LB: loop body
LE: loop exit
PB: predicated region body
PF: predicated region fallthrough
CT: control target
= control target key end

     0   :  { %s690_s0 = inlined_call_operand.vmem [shape: bf16[8,512], index: 0, kind: input, shape index: {}]   ;;  %s691_s1 = inlined_call_operand.vmem [shape: bf16[512,128], index: 1, kind: input, shape index: {}]   ;;  %s692_s2 = inlined_call_operand.vmem [shape: f32[2,128], index: 2, kind: input, shape index: {}]   ;;  %s693_s3 = inlined_call_operand.hbm [shape: f32[8,128], index: 3, kind: output, shape index: {}]  }
   0x1   :  { %v498_v0 = vld [vmem:[%s691_s1 + $0x78] sm:$0xff]   ;;  %v502_v4 = vld [vmem:[%s691_s1 + $0x70] sm:$0xff]   ;;  %v506_v8 = vld [vmem:[%s691_s1 + $0x68] sm:$0xff]  }
   0x2   :  { %v499_v1 = vld [vmem:[%s691_s1 + $0xf8] sm:$0xff]   ;;  %453 = vmatprep.subr.bf16.mxu0 %v498_v0  ;;  %v503_v5 = vld [vmem:[%s691_s1 + $0xf0] sm:$0xff]   ;;  %v507_v9 = vld [vmem:[%s691_s1 + $0xe8] sm:$0xff]  }
   0x3   :  { %v500_v2 = vld [vmem:[%s691_s1 + $0x38] sm:$0xff]   ;;  %475 = vmatprep.subr.bf16.mxu1 %v499_v1  ;;  %v504_v6 = vld [vmem:[%s691_s1 + $0x30] sm:$0xff]   ;;  %v508_v10 = vld [vmem:[%s691_s1 + $0x28] sm:$0xff]  }
   0x4   :  { %v501_v3 = vld [vmem:[%s691_s1 + $0xb8] sm:$0xff]   ;;  %454 = vmatpush3.bf16.msra.mxu0 %v500_v2  ;;  %v505_v7 = vld [vmem:[%s691_s1 + $0xb0] sm:$0xff]   ;;  %v509_v11 = vld [vmem:[%s691_s1 + $0xa8] sm:$0xff]  }
   0x5   :  { %476 = vmatpush3.bf16.msra.mxu1 %v501_v3  ;;  %455 = vmatprep.subr.bf16.mxu0 %v502_v4  ;;  %v510_v12 = vld [vmem:[%s691_s1 + $0x60] sm:$0xff]   ;;  %v514_v16 = vld [vmem:[%s691_s1 + $0x58] sm:$0xff]   ;;  %v518_v20 = vld [vmem:[%s691_s1 + $0x50] sm:$0xff]  }
   0x6   :  { %477 = vmatprep.subr.bf16.mxu1 %v503_v5  ;;  %v511_v13 = vld [vmem:[%s691_s1 + $0xe0] sm:$0xff]   ;;  %v515_v17 = vld [vmem:[%s691_s1 + $0xd8] sm:$0xff]   ;;  %v519_v21 = vld [vmem:[%s691_s1 + $0xd0] sm:$0xff]  }
   0x7   :  { %v512_v14 = vld [vmem:[%s691_s1 + $0x20] sm:$0xff]   ;;  %v516_v18 = vld [vmem:[%s691_s1 + $0x18] sm:$0xff]   ;;  %v520_v22 = vld [vmem:[%s691_s1 + $0x10] sm:$0xff]  }
   0x8   :  { %456 = vmatpush3.bf16.msra.mxu0 %v504_v6  ;;  %v513_v15 = vld [vmem:[%s691_s1 + $0xa0] sm:$0xff]   ;;  %v517_v19 = vld [vmem:[%s691_s1 + $0x98] sm:$0xff]   ;;  %v521_v23 = vld [vmem:[%s691_s1 + $0x90] sm:$0xff]  }
   0x9   :  { %478 = vmatpush3.bf16.msra.mxu1 %v505_v7  ;;  %457 = vmatprep.subr.bf16.mxu0 %v506_v8  ;;  %v522_v24 = vld [vmem:[%s691_s1 + $0x48] sm:$0xff]   ;;  %v526_v28 = vld [vmem:[%s691_s1 + $0x40] sm:$0xff]  }
   0xa   :  { %479 = vmatprep.subr.bf16.mxu1 %v507_v9  ;;  %v523_v25 = vld [vmem:[%s691_s1 + $0xc8] sm:$0xff]   ;;  %v527_v29 = vld [vmem:[%s691_s1 + $0xc0] sm:$0xff]  }
   0xb   :  { %v524_v26 = vld [vmem:[%s691_s1 + $0x8] sm:$0xff]   ;;  %v528_v30 = vld [vmem:[%s691_s1] sm:$0xff]  }
   0xc   :  { %458 = vmatpush3.bf16.msra.mxu0 %v508_v10  ;;  %v525_v27 = vld [vmem:[%s691_s1 + $0x88] sm:$0xff]   ;;  %v529_v31 = vld [vmem:[%s691_s1 + $0x80] sm:$0xff]  }
   0xd   :  { %480 = vmatpush3.bf16.msra.mxu1 %v509_v11  ;;  %459 = vmatprep.subr.bf16.mxu0 %v510_v12  ;;  %v16_v32 = vld [vmem:[%s690_s0] sm:$0xff]  ;;  %v17_v33 = vld [vmem:[%s690_s0 + $0x8] sm:$0xff] }
   0xe   :  { %481 = vmatprep.subr.bf16.mxu1 %v511_v13 }
  0x10   :  { %460 = vmatpush3.bf16.msra.mxu0 %v512_v14 }
  0x11   :  { %482 = vmatpush3.bf16.msra.mxu1 %v513_v15  ;;  %461 = vmatprep.subr.bf16.mxu0 %v514_v16 }
  0x12   :  { %483 = vmatprep.subr.bf16.mxu1 %v515_v17 }
  0x14   :  { %462 = vmatpush3.bf16.msra.mxu0 %v516_v18 }
  0x15   :  { %484 = vmatpush3.bf16.msra.mxu1 %v517_v19  ;;  %463 = vmatprep.subr.bf16.mxu0 %v518_v20 }
  0x16   :  { %485 = vmatprep.subr.bf16.mxu1 %v519_v21 }
  0x18   :  { %464 = vmatpush3.bf16.msra.mxu0 %v520_v22 }
  0x19   :  { %486 = vmatpush3.bf16.msra.mxu1 %v521_v23  ;;  %465 = vmatprep.subr.bf16.mxu0 %v522_v24 }
  0x1a   :  { %487 = vmatprep.subr.bf16.mxu1 %v523_v25 }
  0x1c   :  { %466 = vmatpush3.bf16.msra.mxu0 %v524_v26 }
  0x1d   :  { %488 = vmatpush3.bf16.msra.mxu1 %v525_v27  ;;  %467 = vmatprep.subr.bf16.mxu0 %v526_v28 }
  0x1e   :  { %489 = vmatprep.subr.bf16.mxu1 %v527_v29 }
  0x20   :  { %468 = vmatpush3.bf16.msra.mxu0 %v528_v30 }
  0x21   :  { %8 = vsyncpa [#allocation3], 0  ;;  %490 = vmatpush3.bf16.msra.mxu1 %v529_v31  ;;  %v415_v34 = vcombine.low %v16_v32, %v16_v32  ;;  %v416_v35 = vcombine.high %v16_v32, %v16_v32  ;;  %v417_v36 = vcombine.low %v17_v33, %v17_v33  ;;  %v418_v37 = vcombine.high %v17_v33, %v17_v33  ;;  %v451_v3 = vld [vmem:[%s692_s2] ss:$0 sm:$0xff]  ;;  %v452_v5 = vld [vmem:[%s692_s2 + $0x1] ss:$0 sm:$0xff] }
  0x22   :  { %s558_s28 = smov [#allocation2]  }
  0x23   :  { %320 = vmatprep.mubr.bf16.mxu0 %v416_v35  ;;  %360 = vmatprep.mubr.bf16.mxu1 %v418_v37  ;;  %s407_s29 = sshll.u32 %s558_s28, 4  ;;  %s408_s29 = int_to_ptr.vmem [resolvable:$true] %s407_s29 }
  0x24   :  { %321 = vmatmul.mubr.bf16.vlgmr.msra.gmra.mxu0 %v415_v34  ;;  %361 = vmatmul.mubr.bf16.vlgmr.msra.gmra.mxu1 %v417_v36  ;;  %s536_s30 = scalar_lea.vmem %s408_s29, 128  ;;  %p541_p1 = scmp.lt.s32.totalorder %s408_s29, %s408_s29 }
  0x25   :  { %p537_p0 = scmp.ne.s32.totalorder %s408_s29, %s536_s30  ;;  %p542_p2 = scmp.lt.s32.totalorder %s536_s30, %s536_s30 }
  0x27   :  { %p543_p3 = por %p542_p2, %p541_p1 }
  0x29   :  { %p544_p4 = pnand %p543_p3, %p537_p0 }
  0xe4   :  { %v469_v38 = vpop.f32.mrf.mxu0  ;;  %v491_v39 = vpop.f32.mrf.mxu1 }
  0xe6   :  { %v470_v40 = vpop.f32.mrf.mxu0  ;;  %v492_v41 = vpop.f32.mrf.mxu1 }
  0xe7   :  { %v471_v42 = vadd.f32 %v470_v40, %v469_v38  ;;  %v493_v43 = vadd.f32 %v492_v41, %v491_v39 }
  0xe8   :  { %v472_v44 = vpop.f32.mrf.mxu0  ;;  %v494_v45 = vpop.f32.mrf.mxu1 }
  0xe9   :  { %v363_v46 = vadd.f32 %v493_v43, %v471_v42 }
  0xea   :  { %v473_v47 = vpop.f32.mrf.mxu0  ;;  %v495_v48 = vpop.f32.mrf.mxu1 }
  0xeb   :  { %v368_v49 = vrot.slane %v363_v46, 4 }
  0xed   :  { %v369_v50 = vadd.f32 %v368_v49, %v363_v46 }
  0xef   :  { %v370_v51 = vrot.slane %v369_v50, 2 }
  0xf1   :  { %v371_v52 = vadd.f32 %v370_v51, %v369_v50 }
  0xf3   :  { %v372_v53 = vrot.slane %v371_v52, 1 }
  0xf5   :  { %v373_v54 = vadd.f32 %v372_v53, %v371_v52 }
  0xf7   :  { %v375_v55 = vmul.f32 0.125, %v373_v54 }
  0xf9   :  { %v376_v56 = vsub.f32 %v363_v46, %v375_v55 }
  0xfb   :  { %v377_v57 = vmul.f32 %v376_v56, %v376_v56 }
  0xfd   :  { %v378_v58 = vrot.slane %v377_v57, 4 }
  0xff   :  { %v379_v59 = vadd.f32 %v378_v58, %v377_v57 }
 0x101   :  { %v380_v60 = vrot.slane %v379_v59, 2 }
 0x103   :  { %v381_v61 = vadd.f32 %v380_v60, %v379_v59 }
 0x105   :  { %v382_v62 = vrot.slane %v381_v61, 1 }
 0x107   :  { %v383_v63 = vadd.f32 %v382_v62, %v381_v61 }
 0x109   :  { %v384_v0 = vmul.f32 0.125, %v383_v63 }
 0x10b   :  { %v385_v1 = vadd.f32 1e-05, %v384_v0 }
 0x10d   :  { %534 = vrsqrt.f32 %v385_v1 }
 0x11a   :  { %v535_v2 = vpop.eup %534 }
 0x11b   :  { %v387_v4 = vmul.f32 %v535_v2, %v376_v56 }
 0x11d   :  { %v393_v6 = vmul.f32 %v451_v3, %v387_v4 }
 0x11f   :  { %v399_v7 = vadd.f32 %v452_v5, %v393_v6 }
 0x121   :  { %400 = vst [vmem:[#allocation2] sm:$0xff] %v399_v7 }
 0x122   :  { %547 = shalt.err (!%p544_p4)
}
 0x123   :  { %410 = dma.vmem_to_hbm [thread:$0]  %s408_s29, 128, %s693_s3, [#allocation3]  }
 0x124   :  { %556 = dma.done.wait [#allocation3], 128  }
 0x125   :  { %557 = vsyncadd [#allocation3], 4294967168 }
 0x126   :  { %414 = vsyncpa [#allocation3], 1 }

</bundles_post_ra>
